<compile_context>
chip_gen: v5e
topology: v5e:2x2
jax: 0.10.0
libtpu: 0.0.40
codegen_flags: <defaults>
</compile_context>

<pallas_src>
import functools

import jax
import jax.numpy as jnp
from jax.experimental import pallas as pl
from jax.experimental.pallas import tpu as pltpu


def fire_kernel(x_ref, wsqt_ref, bsq_ref, wc_ref, w3o_ref, b1_ref, b3_ref,
                out_ref, *, H, W, C1, C3):
    # x_ref:    (1, Cin, HW)   one image, channels on sublanes, spatial on lanes
    # wsqt_ref: (Csq, Cin)     squeeze 1x1 weight (transposed)
    # bsq_ref:  (Csq, 1)
    # wc_ref:   (C1+C3, Csq)   fused [expand1x1 | center 3x3 tap] weight (transposed)
    # w3o_ref:  (8, C3, Csq)   the 8 off-center 3x3 taps (transposed, tap-major)
    # b1_ref:   (C1, 1)
    # b3_ref:   (C3, 1)
    # out_ref:  (1, C1+C3, HW)
    HW = H * W
    dt = wc_ref.dtype

    # --- squeeze 1x1 + ReLU: (Csq, Cin) @ (Cin, HW) -> (Csq, HW), f32 acc ---
    s = jnp.dot(wsqt_ref[...], x_ref[0], preferred_element_type=jnp.float32)
    s = jnp.maximum(s + bsq_ref[...], 0.0).astype(dt)   # cast once for the MXU

    # --- boundary masks on the flat per-image spatial index (bit ops: W pow2) ---
    pos = jax.lax.broadcasted_iota(jnp.int32, (1, HW), 1)
    if (W & (W - 1)) == 0:
        ww = pos & (W - 1)
        hh = pos >> (W.bit_length() - 1)
    else:                       # TODO(synk): non-pow2 W falls back to div/mod
        ww = pos % W
        hh = pos // W
    h_lo = (hh >= 1).astype(dt)
    h_hi = (hh <= H - 2).astype(dt)
    w_lo = (ww >= 1).astype(dt)
    w_hi = (ww <= W - 2).astype(dt)

    # --- center tap fused with expand1x1: one (C1+C3, Csq) @ (Csq, HW) matmul ---
    ec = jnp.dot(wc_ref[...], s, preferred_element_type=jnp.float32)
    out_ref[0, 0:C1, :] = jnp.maximum(ec[0:C1, :] + b1_ref[...],
                                      0.0).astype(out_ref.dtype)
    acc = ec[C1:C1 + C3, :]                      # (C3, HW) f32 vreg accumulator

    # --- 8 off-center 3x3 taps: roll + mask s (Csq rows), small matmul, add ---
    tap = 0
    for ky in range(3):
        for kx in range(3):
            if ky == 1 and kx == 1:
                continue
            dy, dx = ky - 1, kx - 1
            d = dy * W + dx                      # out[p] needs s[p + d]
            s_t = pltpu.roll(s, (-d) % HW, axis=1)
            m = None
            if dy == -1:
                m = h_lo
            elif dy == 1:
                m = h_hi
            if dx == -1:
                m = w_lo if m is None else m * w_lo
            elif dx == 1:
                m = w_hi if m is None else m * w_hi
            s_t = s_t * m                        # zero wrapped / out-of-image rows
            acc = acc + jnp.dot(w3o_ref[tap], s_t,
                                preferred_element_type=jnp.float32)
            tap += 1

    out_ref[0, C1:C1 + C3, :] = jnp.maximum(acc + b3_ref[...],
                                            0.0).astype(out_ref.dtype)


def fire_forward(x_nchw, wsq, bsq, w1, b1, w3, b3, *,
                 compute_dtype=jnp.bfloat16, out_dtype=jnp.float32):
    """x_nchw: (N, Cin, H, W) -> (N, C1+C3, H, W).

    compute_dtype=bfloat16 (default) feeds the MXU bf16 inputs while keeping
    f32 accumulation / bias / ReLU; use float32 for bit-tight validation.
    """
    N, Cin, H, W = x_nchw.shape
    Csq = wsq.shape[1]
    C1 = w1.shape[1]
    C3 = w3.shape[3]
    Cout = C1 + C3
    HW = H * W

    # Contiguous reshape only — no HBM transpose; the per-image BlockSpec
    # presents (Cin, HW) with spatial on the 128-lane axis inside the kernel.
    x_flat = x_nchw.reshape(N, Cin, HW).astype(compute_dtype)

    wsqt = wsq.T.astype(compute_dtype)                                  # (Csq, Cin)
    wc = jnp.concatenate([w1.T, w3[1, 1].T], axis=0).astype(compute_dtype)  # (C1+C3, Csq)
    w3o = jnp.stack([w3[ky, kx].T
                     for ky in range(3) for kx in range(3)
                     if not (ky == 1 and kx == 1)],
                    axis=0).astype(compute_dtype)                        # (8, C3, Csq)

    bsq2 = bsq.reshape(Csq, 1).astype(jnp.float32)
    b12 = b1.reshape(C1, 1).astype(jnp.float32)
    b32 = b3.reshape(C3, 1).astype(jnp.float32)

    kernel = functools.partial(fire_kernel, H=H, W=W, C1=C1, C3=C3)

    # TODO(synk): for feature maps where H*W is not a multiple of 128 or a
    # single image's (Cout, HW) tile exceeds VMEM, add a spatial row-tile grid
    # axis with a 1-row halo (tile-seam wraparound is not masked).
    out = pl.pallas_call(
        kernel,
        out_shape=jax.ShapeDtypeStruct((N, Cout, HW), out_dtype),
        grid=(N,),
        in_specs=[
            pl.BlockSpec((1, Cin, HW), lambda n: (n, 0, 0)),     # x: per image
            pl.BlockSpec((Csq, Cin), lambda n: (0, 0)),          # weights: constant
            pl.BlockSpec((Csq, 1), lambda n: (0, 0)),            #   index_map ->
            pl.BlockSpec((Cout, Csq), lambda n: (0, 0)),         #   fetched once,
            pl.BlockSpec((8, C3, Csq), lambda n: (0, 0, 0)),     #   stay resident
            pl.BlockSpec((C1, 1), lambda n: (0, 0)),
            pl.BlockSpec((C3, 1), lambda n: (0, 0)),
        ],
        out_specs=pl.BlockSpec((1, Cout, HW), lambda n: (n, 0, 0)),
        compiler_params=pltpu.CompilerParams(
            dimension_semantics=("parallel",)),                  # v7x: 2 TCs
    )(x_flat, wsqt, bsq2, wc, w3o, b12, b32)

    return out.reshape(N, Cout, H, W)


def fire_reference(x_nchw, wsq, bsq, w1, b1, w3, b3):
    """Pure-JAX f32 reference (NHWC einsums) for validation."""
    x = jnp.transpose(x_nchw, (0, 2, 3, 1))
    H, W = x.shape[1], x.shape[2]
    s = jax.nn.relu(jnp.einsum('nhwc,cd->nhwd', x, wsq) + bsq)
    e1 = jax.nn.relu(jnp.einsum('nhwc,cd->nhwd', s, w1) + b1)
    sp = jnp.pad(s, ((0, 0), (1, 1), (1, 1), (0, 0)))
    acc = 0.0
    for ky in range(3):
        for kx in range(3):
            acc = acc + jnp.einsum('nhwc,cd->nhwd',
                                   sp[:, ky:ky + H, kx:kx + W, :], w3[ky, kx])
    e3 = jax.nn.relu(acc + b3)
    out = jnp.concatenate([e1, e3], axis=-1)
    return jnp.transpose(out, (0, 3, 1, 2))


if __name__ == "__main__":
    # Fire(inplanes=4, squeeze_planes=8, expand1x1_planes=16, expand3x3_planes=16)
    N, Cin, H, W = 2, 4, 16, 16
    Csq, C1, C3 = 8, 16, 16

    key = jax.random.PRNGKey(0)
    ks = jax.random.split(key, 7)
    x = jax.random.normal(ks[0], (N, Cin, H, W), jnp.float32)
    wsq = jax.random.normal(ks[1], (Cin, Csq), jnp.float32) * 0.1
    bsq = jax.random.normal(ks[2], (Csq,), jnp.float32) * 0.1
    w1 = jax.random.normal(ks[3], (Csq, C1), jnp.float32) * 0.1
    b1 = jax.random.normal(ks[4], (C1,), jnp.float32) * 0.1
    w3 = jax.random.normal(ks[5], (3, 3, Csq, C3), jnp.float32) * 0.1
    b3 = jax.random.normal(ks[6], (C3,), jnp.float32) * 0.1

    ref = fire_reference(x, wsq, bsq, w1, b1, w3, b3)

    # f32 path: exact-math validation.
    out_f32 = jax.block_until_ready(
        fire_forward(x, wsq, bsq, w1, b1, w3, b3, compute_dtype=jnp.float32))
    assert out_f32.shape == (N, C1 + C3, H, W), out_f32.shape
    assert jnp.allclose(out_f32, ref, atol=1e-4, rtol=1e-4), "f32 mismatch vs reference"

    # default bf16-matmul path: looser tolerance (bf16 inputs, f32 accumulation).
    out_bf16 = jax.block_until_ready(fire_forward(x, wsq, bsq, w1, b1, w3, b3))
    assert out_bf16.shape == (N, C1 + C3, H, W), out_bf16.shape
    assert jnp.allclose(out_bf16, ref, atol=3e-2, rtol=3e-2), "bf16 mismatch vs reference"

    print("KERNEL_OK")
</pallas_src>

<mosaic_0001>
module attributes {stable_mosaic.version = 11 : i64} {
  func.func @fire_kernel(%arg0: i32, %arg1: memref<1x4x256xf32, #tpu.memory_space<vmem>>, %arg2: memref<8x4xf32, #tpu.memory_space<vmem>>, %arg3: memref<8x1xf32, #tpu.memory_space<vmem>>, %arg4: memref<32x8xf32, #tpu.memory_space<vmem>>, %arg5: memref<8x16x8xf32, #tpu.memory_space<vmem>>, %arg6: memref<16x1xf32, #tpu.memory_space<vmem>>, %arg7: memref<16x1xf32, #tpu.memory_space<vmem>>, %arg8: memref<1x32x256xf32, #tpu.memory_space<vmem>>) attributes {dimension_semantics = [#tpu.dimension_semantics<parallel>], iteration_bounds = array<i64: 2>, scalar_prefetch = 0 : i64, scratch_operands = 0 : i64, tpu.core_type = #tpu.core_type<tc>, window_params = [{transform_indices = @transform_0, window_bounds = array<i64: 1, 4, 256>}, {pipeline_mode = #tpu.pipeline_mode<synchronous>, transform_indices = @transform_1, window_bounds = array<i64: 8, 4>}, {pipeline_mode = #tpu.pipeline_mode<synchronous>, transform_indices = @transform_2, window_bounds = array<i64: 8, 1>}, {pipeline_mode = #tpu.pipeline_mode<synchronous>, transform_indices = @transform_3, window_bounds = array<i64: 32, 8>}, {pipeline_mode = #tpu.pipeline_mode<synchronous>, transform_indices = @transform_4, window_bounds = array<i64: 8, 16, 8>}, {pipeline_mode = #tpu.pipeline_mode<synchronous>, transform_indices = @transform_5, window_bounds = array<i64: 16, 1>}, {pipeline_mode = #tpu.pipeline_mode<synchronous>, transform_indices = @transform_6, window_bounds = array<i64: 16, 1>}, {transform_indices = @transform_7, window_bounds = array<i64: 1, 32, 256>}]} {
    %c0 = arith.constant 0 : index
    %c0_0 = arith.constant 0 : index
    %0 = vector.load %arg2[%c0, %c0_0] : memref<8x4xf32, #tpu.memory_space<vmem>>, vector<8x4xf32>
    %c0_1 = arith.constant 0 : index
    %c0_2 = arith.constant 0 : index
    %c0_3 = arith.constant 0 : index
    %1 = vector.load %arg1[%c0_1, %c0_2, %c0_3] : memref<1x4x256xf32, #tpu.memory_space<vmem>>, vector<1x4x256xf32>
    %2 = vector.shape_cast %1 : vector<1x4x256xf32> to vector<4x256xf32>
    %cst = arith.constant dense<0.000000e+00> : vector<8x256xf32>
    %3 = tpu.matmul %0, %2, %cst {dimension_numbers = #tpu.dot_dimension_numbers<[1], [0], [0], [1], [0, 0, 1, 1], [], []>} : vector<8x4xf32>, vector<4x256xf32>, vector<8x256xf32> -> vector<8x256xf32>
    %c0_4 = arith.constant 0 : index
    %c0_5 = arith.constant 0 : index
    %4 = vector.load %arg3[%c0_4, %c0_5] : memref<8x1xf32, #tpu.memory_space<vmem>>, vector<8x1xf32>
    %5 = vector.broadcast %4 : vector<8x1xf32> to vector<8x256xf32>
    %6 = arith.addf %3, %5 : vector<8x256xf32>
    %cst_6 = arith.constant 0.000000e+00 : f32
    %7 = vector.broadcast %cst_6 : f32 to vector<8x256xf32>
    %8 = arith.maximumf %6, %7 : vector<8x256xf32>
    %9 = tpu.iota {dimensions = array<i32: 1>} : vector<1x256xi32>
    %c15_i32 = arith.constant 15 : i32
    %10 = vector.broadcast %c15_i32 : i32 to vector<1x256xi32>
    %11 = arith.andi %9, %10 : vector<1x256xi32>
    %c4_i32 = arith.constant 4 : i32
    %12 = vector.broadcast %c4_i32 : i32 to vector<1x256xi32>
    %13 = arith.shrsi %9, %12 : vector<1x256xi32>
    %c1_i32 = arith.constant 1 : i32
    %14 = vector.broadcast %c1_i32 : i32 to vector<1x256xi32>
    %15 = arith.cmpi sge, %13, %14 : vector<1x256xi32>
    %16 = arith.extui %15 : vector<1x256xi1> to vector<1x256xi32>
    %17 = arith.sitofp %16 : vector<1x256xi32> to vector<1x256xf32>
    %c14_i32 = arith.constant 14 : i32
    %18 = vector.broadcast %c14_i32 : i32 to vector<1x256xi32>
    %19 = arith.cmpi sle, %13, %18 : vector<1x256xi32>
    %20 = arith.extui %19 : vector<1x256xi1> to vector<1x256xi32>
    %21 = arith.sitofp %20 : vector<1x256xi32> to vector<1x256xf32>
    %c1_i32_7 = arith.constant 1 : i32
    %22 = vector.broadcast %c1_i32_7 : i32 to vector<1x256xi32>
    %23 = arith.cmpi sge, %11, %22 : vector<1x256xi32>
    %24 = arith.extui %23 : vector<1x256xi1> to vector<1x256xi32>
    %25 = arith.sitofp %24 : vector<1x256xi32> to vector<1x256xf32>
    %c14_i32_8 = arith.constant 14 : i32
    %26 = vector.broadcast %c14_i32_8 : i32 to vector<1x256xi32>
    %27 = arith.cmpi sle, %11, %26 : vector<1x256xi32>
    %28 = arith.extui %27 : vector<1x256xi1> to vector<1x256xi32>
    %29 = arith.sitofp %28 : vector<1x256xi32> to vector<1x256xf32>
    %c0_9 = arith.constant 0 : index
    %c0_10 = arith.constant 0 : index
    %30 = vector.load %arg4[%c0_9, %c0_10] : memref<32x8xf32, #tpu.memory_space<vmem>>, vector<32x8xf32>
    %cst_11 = arith.constant dense<0.000000e+00> : vector<32x256xf32>
    %31 = tpu.matmul %30, %8, %cst_11 {dimension_numbers = #tpu.dot_dimension_numbers<[1], [0], [0], [1], [0, 0, 1, 1], [], []>} : vector<32x8xf32>, vector<8x256xf32>, vector<32x256xf32> -> vector<32x256xf32>
    %32 = vector.extract_strided_slice %31 {offsets = [0, 0], sizes = [16, 256], strides = [1, 1]} : vector<32x256xf32> to vector<16x256xf32>
    %c0_12 = arith.constant 0 : index
    %c0_13 = arith.constant 0 : index
    %33 = vector.load %arg6[%c0_12, %c0_13] : memref<16x1xf32, #tpu.memory_space<vmem>>, vector<16x1xf32>
    %34 = vector.broadcast %33 : vector<16x1xf32> to vector<16x256xf32>
    %35 = arith.addf %32, %34 : vector<16x256xf32>
    %cst_14 = arith.constant 0.000000e+00 : f32
    %36 = vector.broadcast %cst_14 : f32 to vector<16x256xf32>
    %37 = arith.maximumf %35, %36 : vector<16x256xf32>
    %c0_15 = arith.constant 0 : index
    %c0_16 = arith.constant 0 : index
    %c0_17 = arith.constant 0 : index
    %38 = vector.load %arg8[%c0_15, %c0_16, %c0_17] : memref<1x32x256xf32, #tpu.memory_space<vmem>>, vector<1x16x256xf32>
    %39 = vector.shape_cast %38 : vector<1x16x256xf32> to vector<16x256xf32>
    %40 = vector.shape_cast %37 : vector<16x256xf32> to vector<1x16x256xf32>
    tpu.vector_store %arg8[%c0_15, %c0_16, %c0_17], %40 {strides = array<i32>} : memref<1x32x256xf32, #tpu.memory_space<vmem>>, vector<1x16x256xf32>,
    %41 = vector.extract_strided_slice %31 {offsets = [16, 0], sizes = [16, 256], strides = [1, 1]} : vector<32x256xf32> to vector<16x256xf32>
    %c17_i32 = arith.constant 17 : i32
    %42 = tpu.dynamic_rotate %8 by %c17_i32 dim 1 : vector<8x256xf32>, i32 -> vector<8x256xf32>
    %43 = arith.mulf %17, %25 : vector<1x256xf32>
    %44 = vector.broadcast %43 : vector<1x256xf32> to vector<8x256xf32>
    %45 = arith.mulf %42, %44 : vector<8x256xf32>
    %c0_18 = arith.constant 0 : index
    %c0_19 = arith.constant 0 : index
    %c0_20 = arith.constant 0 : index
    %46 = vector.load %arg5[%c0_18, %c0_19, %c0_20] : memref<8x16x8xf32, #tpu.memory_space<vmem>>, vector<1x16x8xf32>
    %47 = vector.shape_cast %46 : vector<1x16x8xf32> to vector<16x8xf32>
    %cst_21 = arith.constant dense<0.000000e+00> : vector<16x256xf32>
    %48 = tpu.matmul %47, %45, %cst_21 {dimension_numbers = #tpu.dot_dimension_numbers<[1], [0], [0], [1], [0, 0, 1, 1], [], []>} : vector<16x8xf32>, vector<8x256xf32>, vector<16x256xf32> -> vector<16x256xf32>
    %49 = arith.addf %41, %48 : vector<16x256xf32>
    %c16_i32 = arith.constant 16 : i32
    %50 = tpu.dynamic_rotate %8 by %c16_i32 dim 1 : vector<8x256xf32>, i32 -> vector<8x256xf32>
    %51 = vector.broadcast %17 : vector<1x256xf32> to vector<8x256xf32>
    %52 = arith.mulf %50, %51 : vector<8x256xf32>
    %c1 = arith.constant 1 : index
    %c0_22 = arith.constant 0 : index
    %c0_23 = arith.constant 0 : index
    %53 = vector.load %arg5[%c1, %c0_22, %c0_23] : memref<8x16x8xf32, #tpu.memory_space<vmem>>, vector<1x16x8xf32>
    %54 = vector.shape_cast %53 : vector<1x16x8xf32> to vector<16x8xf32>
    %cst_24 = arith.constant dense<0.000000e+00> : vector<16x256xf32>
    %55 = tpu.matmul %54, %52, %cst_24 {dimension_numbers = #tpu.dot_dimension_numbers<[1], [0], [0], [1], [0, 0, 1, 1], [], []>} : vector<16x8xf32>, vector<8x256xf32>, vector<16x256xf32> -> vector<16x256xf32>
    %56 = arith.addf %49, %55 : vector<16x256xf32>
    %c15_i32_25 = arith.constant 15 : i32
    %57 = tpu.dynamic_rotate %8 by %c15_i32_25 dim 1 : vector<8x256xf32>, i32 -> vector<8x256xf32>
    %58 = arith.mulf %17, %29 : vector<1x256xf32>
    %59 = vector.broadcast %58 : vector<1x256xf32> to vector<8x256xf32>
    %60 = arith.mulf %57, %59 : vector<8x256xf32>
    %c2 = arith.constant 2 : index
    %c0_26 = arith.constant 0 : index
    %c0_27 = arith.constant 0 : index
    %61 = vector.load %arg5[%c2, %c0_26, %c0_27] : memref<8x16x8xf32, #tpu.memory_space<vmem>>, vector<1x16x8xf32>
    %62 = vector.shape_cast %61 : vector<1x16x8xf32> to vector<16x8xf32>
    %cst_28 = arith.constant dense<0.000000e+00> : vector<16x256xf32>
    %63 = tpu.matmul %62, %60, %cst_28 {dimension_numbers = #tpu.dot_dimension_numbers<[1], [0], [0], [1], [0, 0, 1, 1], [], []>} : vector<16x8xf32>, vector<8x256xf32>, vector<16x256xf32> -> vector<16x256xf32>
    %64 = arith.addf %56, %63 : vector<16x256xf32>
    %c1_i32_29 = arith.constant 1 : i32
    %65 = tpu.dynamic_rotate %8 by %c1_i32_29 dim 1 : vector<8x256xf32>, i32 -> vector<8x256xf32>
    %66 = vector.broadcast %25 : vector<1x256xf32> to vector<8x256xf32>
    %67 = arith.mulf %65, %66 : vector<8x256xf32>
    %c3 = arith.constant 3 : index
    %c0_30 = arith.constant 0 : index
    %c0_31 = arith.constant 0 : index
    %68 = vector.load %arg5[%c3, %c0_30, %c0_31] : memref<8x16x8xf32, #tpu.memory_space<vmem>>, vector<1x16x8xf32>
    %69 = vector.shape_cast %68 : vector<1x16x8xf32> to vector<16x8xf32>
    %cst_32 = arith.constant dense<0.000000e+00> : vector<16x256xf32>
    %70 = tpu.matmul %69, %67, %cst_32 {dimension_numbers = #tpu.dot_dimension_numbers<[1], [0], [0], [1], [0, 0, 1, 1], [], []>} : vector<16x8xf32>, vector<8x256xf32>, vector<16x256xf32> -> vector<16x256xf32>
    %71 = arith.addf %64, %70 : vector<16x256xf32>
    %c255_i32 = arith.constant 255 : i32
    %72 = tpu.dynamic_rotate %8 by %c255_i32 dim 1 : vector<8x256xf32>, i32 -> vector<8x256xf32>
    %73 = vector.broadcast %29 : vector<1x256xf32> to vector<8x256xf32>
    %74 = arith.mulf %72, %73 : vector<8x256xf32>
    %c4 = arith.constant 4 : index
    %c0_33 = arith.constant 0 : index
    %c0_34 = arith.constant 0 : index
    %75 = vector.load %arg5[%c4, %c0_33, %c0_34] : memref<8x16x8xf32, #tpu.memory_space<vmem>>, vector<1x16x8xf32>
    %76 = vector.shape_cast %75 : vector<1x16x8xf32> to vector<16x8xf32>
    %cst_35 = arith.constant dense<0.000000e+00> : vector<16x256xf32>
    %77 = tpu.matmul %76, %74, %cst_35 {dimension_numbers = #tpu.dot_dimension_numbers<[1], [0], [0], [1], [0, 0, 1, 1], [], []>} : vector<16x8xf32>, vector<8x256xf32>, vector<16x256xf32> -> vector<16x256xf32>
    %78 = arith.addf %71, %77 : vector<16x256xf32>
    %c241_i32 = arith.constant 241 : i32
    %79 = tpu.dynamic_rotate %8 by %c241_i32 dim 1 : vector<8x256xf32>, i32 -> vector<8x256xf32>
    %80 = arith.mulf %21, %25 : vector<1x256xf32>
    %81 = vector.broadcast %80 : vector<1x256xf32> to vector<8x256xf32>
    %82 = arith.mulf %79, %81 : vector<8x256xf32>
    %c5 = arith.constant 5 : index
    %c0_36 = arith.constant 0 : index
    %c0_37 = arith.constant 0 : index
    %83 = vector.load %arg5[%c5, %c0_36, %c0_37] : memref<8x16x8xf32, #tpu.memory_space<vmem>>, vector<1x16x8xf32>
    %84 = vector.shape_cast %83 : vector<1x16x8xf32> to vector<16x8xf32>
    %cst_38 = arith.constant dense<0.000000e+00> : vector<16x256xf32>
    %85 = tpu.matmul %84, %82, %cst_38 {dimension_numbers = #tpu.dot_dimension_numbers<[1], [0], [0], [1], [0, 0, 1, 1], [], []>} : vector<16x8xf32>, vector<8x256xf32>, vector<16x256xf32> -> vector<16x256xf32>
    %86 = arith.addf %78, %85 : vector<16x256xf32>
    %c240_i32 = arith.constant 240 : i32
    %87 = tpu.dynamic_rotate %8 by %c240_i32 dim 1 : vector<8x256xf32>, i32 -> vector<8x256xf32>
    %88 = vector.broadcast %21 : vector<1x256xf32> to vector<8x256xf32>
    %89 = arith.mulf %87, %88 : vector<8x256xf32>
    %c6 = arith.constant 6 : index
    %c0_39 = arith.constant 0 : index
    %c0_40 = arith.constant 0 : index
    %90 = vector.load %arg5[%c6, %c0_39, %c0_40] : memref<8x16x8xf32, #tpu.memory_space<vmem>>, vector<1x16x8xf32>
    %91 = vector.shape_cast %90 : vector<1x16x8xf32> to vector<16x8xf32>
    %cst_41 = arith.constant dense<0.000000e+00> : vector<16x256xf32>
    %92 = tpu.matmul %91, %89, %cst_41 {dimension_numbers = #tpu.dot_dimension_numbers<[1], [0], [0], [1], [0, 0, 1, 1], [], []>} : vector<16x8xf32>, vector<8x256xf32>, vector<16x256xf32> -> vector<16x256xf32>
    %93 = arith.addf %86, %92 : vector<16x256xf32>
    %c239_i32 = arith.constant 239 : i32
    %94 = tpu.dynamic_rotate %8 by %c239_i32 dim 1 : vector<8x256xf32>, i32 -> vector<8x256xf32>
    %95 = arith.mulf %21, %29 : vector<1x256xf32>
    %96 = vector.broadcast %95 : vector<1x256xf32> to vector<8x256xf32>
    %97 = arith.mulf %94, %96 : vector<8x256xf32>
    %c7 = arith.constant 7 : index
    %c0_42 = arith.constant 0 : index
    %c0_43 = arith.constant 0 : index
    %98 = vector.load %arg5[%c7, %c0_42, %c0_43] : memref<8x16x8xf32, #tpu.memory_space<vmem>>, vector<1x16x8xf32>
    %99 = vector.shape_cast %98 : vector<1x16x8xf32> to vector<16x8xf32>
    %cst_44 = arith.constant dense<0.000000e+00> : vector<16x256xf32>
    %100 = tpu.matmul %99, %97, %cst_44 {dimension_numbers = #tpu.dot_dimension_numbers<[1], [0], [0], [1], [0, 0, 1, 1], [], []>} : vector<16x8xf32>, vector<8x256xf32>, vector<16x256xf32> -> vector<16x256xf32>
    %101 = arith.addf %93, %100 : vector<16x256xf32>
    %c0_45 = arith.constant 0 : index
    %c0_46 = arith.constant 0 : index
    %102 = vector.load %arg7[%c0_45, %c0_46] : memref<16x1xf32, #tpu.memory_space<vmem>>, vector<16x1xf32>
    %103 = vector.broadcast %102 : vector<16x1xf32> to vector<16x256xf32>
    %104 = arith.addf %101, %103 : vector<16x256xf32>
    %cst_47 = arith.constant 0.000000e+00 : f32
    %105 = vector.broadcast %cst_47 : f32 to vector<16x256xf32>
    %106 = arith.maximumf %104, %105 : vector<16x256xf32>
    %c0_48 = arith.constant 0 : index
    %c16 = arith.constant 16 : index
    %c0_49 = arith.constant 0 : index
    %107 = vector.load %arg8[%c0_48, %c16, %c0_49] : memref<1x32x256xf32, #tpu.memory_space<vmem>>, vector<1x16x256xf32>
    %108 = vector.shape_cast %107 : vector<1x16x256xf32> to vector<16x256xf32>
    %109 = vector.shape_cast %106 : vector<16x256xf32> to vector<1x16x256xf32>
    tpu.vector_store %arg8[%c0_48, %c16, %c0_49], %109 {strides = array<i32>} : memref<1x32x256xf32, #tpu.memory_space<vmem>>, vector<1x16x256xf32>,
    return
  }
  func.func @transform_0(%arg0: i32) -> (i32, i32, i32) {
    %c0_i32 = arith.constant 0 : i32
    %c0_i32_0 = arith.constant 0 : i32
    %c0_i32_1 = arith.constant 0 : i32
    return %arg0, %c0_i32, %c0_i32_0 : i32, i32, i32
  }
  func.func @transform_1(%arg0: i32) -> (i32, i32) {
    %c0_i32 = arith.constant 0 : i32
    %c0_i32_0 = arith.constant 0 : i32
    %c0_i32_1 = arith.constant 0 : i32
    return %c0_i32, %c0_i32_0 : i32, i32
  }
  func.func @transform_2(%arg0: i32) -> (i32, i32) {
    %c0_i32 = arith.constant 0 : i32
    %c0_i32_0 = arith.constant 0 : i32
    %c0_i32_1 = arith.constant 0 : i32
    return %c0_i32, %c0_i32_0 : i32, i32
  }
  func.func @transform_3(%arg0: i32) -> (i32, i32) {
    %c0_i32 = arith.constant 0 : i32
    %c0_i32_0 = arith.constant 0 : i32
    %c0_i32_1 = arith.constant 0 : i32
    return %c0_i32, %c0_i32_0 : i32, i32
  }
  func.func @transform_4(%arg0: i32) -> (i32, i32, i32) {
    %c0_i32 = arith.constant 0 : i32
    %c0_i32_0 = arith.constant 0 : i32
    %c0_i32_1 = arith.constant 0 : i32
    %c0_i32_2 = arith.constant 0 : i32
    return %c0_i32, %c0_i32_0, %c0_i32_1 : i32, i32, i32
  }
  func.func @transform_5(%arg0: i32) -> (i32, i32) {
    %c0_i32 = arith.constant 0 : i32
    %c0_i32_0 = arith.constant 0 : i32
    %c0_i32_1 = arith.constant 0 : i32
    return %c0_i32, %c0_i32_0 : i32, i32
  }
  func.func @transform_6(%arg0: i32) -> (i32, i32) {
    %c0_i32 = arith.constant 0 : i32
    %c0_i32_0 = arith.constant 0 : i32
    %c0_i32_1 = arith.constant 0 : i32
    return %c0_i32, %c0_i32_0 : i32, i32
  }
  func.func @transform_7(%arg0: i32) -> (i32, i32, i32) {
    %c0_i32 = arith.constant 0 : i32
    %c0_i32_0 = arith.constant 0 : i32
    %c0_i32_1 = arith.constant 0 : i32
    return %arg0, %c0_i32, %c0_i32_0 : i32, i32, i32
  }
}

</mosaic_0001>

<bundles_post_ra>
// kernel: tpu_custom_call.1
= control target key start
LH: loop header
LB: loop body
LE: loop exit
PB: predicated region body
PF: predicated region fallthrough
CT: control target
= control target key end

     0   :  { %12 = vsyncpa [#allocation3], 0  ;;  %s1647_s0 = inlined_call_operand.vmem [shape: f32[2,4,256], index: 0, kind: input, shape index: {}]   ;;  %s1648_s1 = inlined_call_operand.vmem [shape: f32[8,4], index: 1, kind: input, shape index: {}]   ;;  %s1649_s2 = inlined_call_operand.vmem [shape: f32[8,1], index: 2, kind: input, shape index: {}]   ;;  %s1650_s3 = inlined_call_operand.vmem [shape: f32[32,8], index: 3, kind: input, shape index: {}]   ;;  %s1651_s4 = inlined_call_operand.vmem [shape: f32[8,16,8], index: 4, kind: input, shape index: {}]   ;;  %s1652_s5 = inlined_call_operand.vmem [shape: f32[16,1], index: 5, kind: input, shape index: {}]   ;;  %s1653_s6 = inlined_call_operand.vmem [shape: f32[16,1], index: 6, kind: input, shape index: {}]   ;;  %s1654_s7 = inlined_call_operand.hbm [shape: f32[2,32,256], index: 7, kind: output, shape index: {}]  }
   0x1   :  { %14 = vsyncpa [#allocation3 + $0x1], 0  ;;  %s1371_s24 = smov 0   ;;  %s1373_s25 = smov 0  }
   0x2   :  { %s1375_s26 = smov 0   ;;  %s1377_s27 = smov 0  }
   0x3 LB: > { %s1392_s28 = sadd.s32 4294967295, %s1318_s27   ;;  %s1123_s29 = sadd.s32 4294967294, %s1318_s27   ;;  %s1318_s27 = sphi %s1377_s27, %s1660_s27   ;;  %s1314_s26 = sphi %s1375_s26, %s1659_s26   ;;  %s1310_s25 = sphi %s1373_s25, %s1658_s25   ;;  %s1306_s24 = sphi %s1371_s24, %s1657_s24  }
   0x4   : > { %s1396_s30 = sadd.s32 1, %s1318_s27   ;;  %s179_s8 = sadd.s32 1, %s1314_s26 }
   0x5   : > { %s176_s9 = ssub.s32 %s1318_s27, %s1396_s30  ;;  %p189_p0 = scmp.ne.s32.totalorder %s1314_s26, %s1310_s25 }
   0x6   : > { %p177_p1 = scmp.eq.s32.totalorder %s176_s9, 0  ;;  %p190_p2 = scmp.eq.s32.totalorder %s1392_s28, 1 }
   0x7   : > { %p195_p3 = scmp.ne.s32.totalorder %s1310_s25, %s1306_s24  ;;  %p196_p4 = scmp.eq.s32.totalorder %s1123_s29, 1 }
   0x8   : > { %s1407_s10 = scalar_select %p177_p1, %s1314_s26, %s179_s8  }
   0x9   : > { %p1409_p5 = por %p190_p2, %p189_p0  ;;  %p1413_p6 = por %p196_p4, %p195_p3 }
   0xa   : > { %p1126_p7 = scmp.ge.s32.totalorder %s1318_s27, 1  ;;  %p240_p8 = scmp.lt.s32.totalorder %s1318_s27, 3 }
   0xc   : > { %p241_p9 = pnand %p1126_p7, %p240_p8 }
   0xd   : > { %p272_p10 = scmp.lt.s32.totalorder (!%p241_p9), %s1392_s28, 1  ;;  %s1321_s29 = smov (!%p241_p9), 16  }
   0xe   : > { %244 = sbr.rel (%p241_p9) target bundleno = 492 (0x1ec), region = 48  ;;  %s1322_s8 = smov (!%p241_p9), 17  }
   0xf   : > { %s1323_s14 = smov (!%p241_p9), 15   ;;  %s1326_s17 = smov (!%p241_p9), 113  }
  0x10   : > { %s1327_s18 = smov (!%p241_p9), 112   ;;  %s269_s20 = sand.u32 (!%p241_p9), 1, %s1310_s25  }
  0x11   : > { %s1127_s21 = sshll.u32 (!%p241_p9), %s269_s20, 6  ;;  %s1046_s23 = scalar_lea.sflag (!%p241_p9), [#allocation3], %s269_s20 }
  0x12   : > { %s1565_s13 = scalar_lea.vmem (!%p241_p9), [#allocation2], %s1127_s21 }
  0x13   : > { %v279_v0 = vld [vmem:[%s1649_s2] sm:$0xff]  ;;  %v1320_v1 = vmov 0   ;;  %s273_s15 = scalar_select %p272_p10, %s1392_s28, 1  ;;  %vm293_vm0 = vcmask 1043456   ;;  %vm289_vm1 = vcmask 31744   ;;  %vm375_vm2 = vcmask 64512  }
  0x14   : > { %1253 = vset.pattern.permute.xlu0 %v1320_v1  ;;  %1254 = vset.pattern.permute.xlu2 %v1320_v1  ;;  %v277_v3 = vld [vmem:[%s1648_s1] sm:$0xff]  ;;  %v372_v14 = vld [vmem:[%s1650_s3 + $0x8] sm:$0xff]  ;;  %v373_v16 = vld [vmem:[%s1650_s3 + $0x10] sm:$0xff]  ;;  %v340_v18 = vlaneseq  ;;  %v1329_v26 = vmov 0.0   ;;  %s1058_s22 = sshll.u32 %s1565_s13, 4  ;;  %s1059_s22 = int_to_ptr.vmem [resolvable:$true] %s1058_s22 }
  0x15   : > { %282 = vperm.xlu0 %1253, %v279_v0   ;;  %1255 = vset.pattern.permute.xlu1 %v1320_v1  ;;  %s1201_s16 = sshll.u32 %s273_s15, 3  ;;  %v371_v13 = vld [vmem:[%s1650_s3] sm:$0xff]  ;;  %s1324_s15 = smov 1   ;;  %v447_v15 = vld [vmem:[%s1652_s5 + $0x8] sm:$0xff]  ;;  %v374_v17 = vld [vmem:[%s1650_s3 + $0x18] sm:$0xff] }
  0x16   : > { %s276_s19 = scalar_lea.vmem %s1647_s0, %s1201_s16  ;;  %s1325_s16 = smov 127   ;;  %v1455_v19 = vand.u32 127, %v340_v18  ;;  %v481_v40 = vld [vmem:[%s1651_s4] sm:$0xff]  ;;  %v482_v56 = vld [vmem:[%s1651_s4 + $0x8] sm:$0xff]  ;;  %v1154_v1 = vld [vmem:[%s1651_s4 + $0x10] sm:$0xff] }
  0x17   : > { %v278_v2 = vld [vmem:[%s276_s19] sm:$0xff]  ;;  %s1328_s19 = smov 111   ;;  %v1155_v18 = vld [vmem:[%s1651_s4 + $0x18] sm:$0xff] }
  0x18   : > { %286 = vst [vmem:[#allocation1] ss:$2 sm:$0xff] %v278_v2  ;;  %v1458_v20 = vadd.s32 128, %v1455_v19  ;;  %v345_v21 = vshra.s32 %v1455_v19, 4  ;;  %v343_v22 = vand.u32 15, %v1455_v19  ;;  %vm474_vm7 = vcmp.lt.s32.totalorder %v1455_v19, 17 }
  0x19   : > { %vm543_vm10 = vcmp.lt.s32.totalorder %v1455_v19, 16  ;;  %vm611_vm11 = vcmp.lt.s32.totalorder %v1455_v19, 15  ;;  %v446_v45 = vld [vmem:[%s1652_s5] sm:$0xff]  ;;  %vm681_vm12 = vcmp.lt.s32.totalorder %v1455_v19, 1  ;;  %vm749_vm15 = vcmp.lt.s32.totalorder %v1455_v19, 127 }
  0x1a   : > { %v344_v23 = vand.u32 15, %v1458_v20  ;;  %v346_v24 = vshra.s32 %v1458_v20, 4  ;;  %vm347_vm3 = vcmp.ge.s32.totalorder %v345_v21, 1  ;;  %vm359_vm4 = vcmp.ge.s32.totalorder %v343_v22, 1  ;;  %v1160_v58 = vld [vmem:[%s1651_s4 + $0x20] sm:$0xff] }
  0x1b   : > { %v1134_v27 = vsel %vm347_vm3, 1.0, %v1329_v26  ;;  %v1468_v28 = vsel %vm359_vm4, 1.0, %v1329_v26  ;;  %vm365_vm8 = vcmp.le.s32.totalorder %v343_v22, 14  ;;  %vm353_vm13 = vcmp.le.s32.totalorder %v345_v21, 14  ;;  %v1172_v20 = vld [vmem:[%s1651_s4 + $0x40] sm:$0xff] }
  0x1c   : > { %vm348_vm5 = vcmp.ge.s32.totalorder %v346_v24, 1  ;;  %vm360_vm6 = vcmp.ge.s32.totalorder %v344_v23, 1  ;;  %v477_v31 = vmul.f32 %v1468_v28, %v1134_v27  ;;  %vm366_vm9 = vcmp.le.s32.totalorder %v344_v23, 14 }
  0x1d   : > { %v1135_v29 = vsel %vm348_vm5, 1.0, %v1329_v26  ;;  %v1472_v30 = vsel %vm360_vm6, 1.0, %v1329_v26  ;;  %v1481_v41 = vsel %vm365_vm8, 1.0, %v1329_v26  ;;  %v1484_v42 = vsel %vm366_vm9, 1.0, %v1329_v26 }
  0x1e   : > { %v478_v32 = vmul.f32 %v1472_v30, %v1135_v29  ;;  %v614_v43 = vmul.f32 %v1481_v41, %v1134_v27  ;;  %v615_v44 = vmul.f32 %v1484_v42, %v1135_v29  ;;  %vm354_vm14 = vcmp.le.s32.totalorder %v346_v24, 14 }
  0x1f   : > { %v287_v4 = vld.sshfl [vmem:[#allocation1] sm:$0xff pattern:$0x75316420]  ;;  %v288_v5 = vld.sshfl [vmem:[#allocation1 + $0x8] sm:$0xff pattern:$0x75316420] }
  0x20   : > { %1130 = vmatpush.msk.msra.mxu0 %vm293_vm0, %v287_v4  ;;  %1132 = vmatpush.msk.msra.mxu1 %vm293_vm0, %v288_v5  ;;  %v1136_v2 = vsel %vm353_vm13, 1.0, %v1329_v26  ;;  %v1161_v4 = vld [vmem:[%s1651_s4 + $0x28] sm:$0xff]  ;;  %vm817_vm0 = vcmp.lt.s32.totalorder %v1455_v19, 113  ;;  %vm955_vm3 = vcmp.lt.s32.totalorder %v1455_v19, 111 }
  0x21   : > { %1131 = vmatmul.msk.f32.vlgmr.msra.gmra.mxu0 %vm289_vm1, %v277_v3  ;;  %1133 = vmatmul.msk.f32.vlgmr.msra.gmra.mxu1 %vm289_vm1, %v277_v3  ;;  %v1137_v3 = vsel %vm354_vm14, 1.0, %v1329_v26  ;;  %vm887_vm1 = vcmp.lt.s32.totalorder %v1455_v19, 112 }
  0x87   : > { %v283_v6 = vpop.permute.xlu0 %282 }
  0x9e   : > { %v315_v7 = vpop.f32.mrf.mxu0  ;;  %v335_v8 = vpop.f32.mrf.mxu1 }
  0x9f   : > { %v316_v9 = vadd.f32 %v315_v7, %v283_v6  ;;  %v336_v10 = vadd.f32 %v335_v8, %v283_v6  ;;  %v820_v6 = vmul.f32 %v1468_v28, %v1136_v2  ;;  %v821_v7 = vmul.f32 %v1472_v30, %v1137_v3 }
  0xa1   : > { %v338_v11 = vmax.f32 %v316_v9, 0.0  ;;  %v339_v12 = vmax.f32 %v336_v10, 0.0 }
  0xa3   : > { %541 = vrot.lane.b32.xlu2 %v339_v12, %s1321_s29  ;;  %472 = vrot.lane.b32.xlu1 %v339_v12, %s1322_s8 }
  0xa4   : > { %432 = vmatpush.msra.mxu3 %v339_v12  ;;  %470 = vrot.lane.b32.xlu0 %v338_v11, %s1322_s8 }
  0xa5   : > { %403 = vmatpush.msra.mxu2 %v338_v11  ;;  %1146 = vmatmul.msk.f32.vlgmr.msra.gmra.mxu3 %vm375_vm2, %v371_v13 }
  0xa6   : > { %1142 = vmatmul.msk.f32.vlgmr.msra.gmra.mxu2 %vm375_vm2, %v371_v13 }
  0xab   : > { %607 = vrot.lane.b32.xlu2 %v338_v11, %s1323_s14  ;;  %539 = vrot.lane.b32.xlu1 %v338_v11, %s1321_s29 }
  0xac   : > { %609 = vrot.lane.b32.xlu0 %v339_v12, %s1323_s14 }
  0xad   : > { %1147 = vmatmul.msk.f32.gmra.mxu3 %vm375_vm2, %v372_v14 }
  0xae   : > { %1143 = vmatmul.msk.f32.gmra.mxu2 %vm375_vm2, %v372_v14 }
  0xb3   : > { %679 = vrot.lane.b32.xlu2 %v339_v12, %s1324_s15  ;;  %677 = vrot.lane.b32.xlu1 %v338_v11, %s1324_s15 }
  0xb4   : > { %745 = vrot.lane.b32.xlu0 %v338_v11, %s1325_s16 }
  0xb5   : > { %1148 = vmatmul.msk.f32.gmra.mxu3 %vm375_vm2, %v373_v16 }
  0xb6   : > { %1144 = vmatmul.msk.f32.gmra.mxu2 %vm375_vm2, %v373_v16 }
  0xbb   : > { %813 = vrot.lane.b32.xlu2 %v338_v11, %s1326_s17  ;;  %747 = vrot.lane.b32.xlu1 %v339_v12, %s1325_s16  ;;  %s1276_s16 = scalar_lea.hbm %s1654_s7, 128 }
  0xbc   : > { %815 = vrot.lane.b32.xlu0 %v339_v12, %s1326_s17  ;;  %s1202_s17 = sshll.u32 %s1392_s28, 6 }
  0xbd   : > { %1149 = vmatmul.msk.f32.gmra.mxu3 %vm375_vm2, %v374_v17  ;;  %s1057_s21 = scalar_lea.hbm %s1654_s7, %s1202_s17 }
  0xbe   : > { %1145 = vmatmul.msk.f32.gmra.mxu2 %vm375_vm2, %v374_v17  ;;  %s1060_s28 = sshll.u32 %s1057_s21, 4  ;;  %s1061_s28 = int_to_ptr.hbm [resolvable:$true] %s1060_s28 }
  0xbf   : > { %s1270_s8 = sshra.s32 %s1061_s28, 4  ;;  %s1271_s8 = int_to_ptr.hbm [resolvable:$true] %s1270_s8 }
  0xc0   : > { %s1272_s9 = scalar_lea.hbm %s1271_s8, 64  ;;  %p1277_p0 = scmp.lt.s32.totalorder %s1271_s8, %s1654_s7 }
  0xc1   : > { %p1273_p11 = scmp.ne.s32.totalorder %s1271_s8, %s1272_s9  ;;  %p1278_p1 = scmp.lt.s32.totalorder %s1276_s16, %s1272_s9 }
  0xc3   : > { %885 = vrot.lane.b32.xlu2 %v339_v12, %s1327_s18  ;;  %883 = vrot.lane.b32.xlu1 %v338_v11, %s1327_s18  ;;  %p1274_p12 = pnand %p1273_p11, %p1409_p5  ;;  %p1279_p2 = por %p1278_p1, %p1277_p0 }
  0xc4   : > { %951 = vrot.lane.b32.xlu0 %v338_v11, %s1328_s19 }
  0xc5   : > { %p1275_p13 = pneg %p1274_p12 }
  0xc7   : > { %p1280_p3 = pnand %p1279_p2, %p1275_p13 }
  0xcb   : > { %953 = vrot.lane.b32.xlu1 %v339_v12, %s1328_s19  ;;  %450 = vperm.xlu2 %1254, %v446_v45  }
  0xcc   : > { %455 = vperm.xlu0 %1253, %v447_v15  }
  0xfd   : > { %v542_v25 = vpop.permute.xlu2 %541 }
 0x105   : > { %v608_v35 = vpop.permute.xlu2 %607 }
 0x10d   : > { %v680_v57 = vpop.permute.xlu2 %679 }
 0x115   : > { %v473_v33 = vpop.permute.xlu1 %472  ;;  %v814_v5 = vpop.permute.xlu2 %813 }
 0x116   : > { %v471_v34 = vpop.permute.xlu0 %470 }
 0x117   : > { %v475_v36 = vsel %vm474_vm7, %v471_v34, %v473_v33  ;;  %v476_v37 = vsel %vm474_vm7, %v473_v33, %v471_v34  ;;  %v959_v33 = vmul.f32 %v1484_v42, %v1137_v3 }
 0x118   : > { %v479_v38 = vmul.f32 %v477_v31, %v476_v37  ;;  %v480_v39 = vmul.f32 %v478_v32, %v475_v36  ;;  %v1173_v31 = vld [vmem:[%s1651_s4 + $0x48] sm:$0xff]  ;;  %v958_v32 = vmul.f32 %v1481_v41, %v1136_v2 }
 0x11a   : > { %504 = vmatpush.msrb.mxu0 %v479_v38  ;;  %527 = vmatpush.msrb.mxu1 %v480_v39 }
 0x11b   : > { %1150 = vmatmul.msk.f32.vlgmr.msrb.gmra.mxu0 %vm375_vm2, %v481_v40  ;;  %1152 = vmatmul.msk.f32.vlgmr.msrb.gmra.mxu1 %vm375_vm2, %v481_v40 }
 0x11d   : > { %v540_v46 = vpop.permute.xlu1 %539  ;;  %v886_v23 = vpop.permute.xlu2 %885 }
 0x11e   : > { %v544_v47 = vsel %vm543_vm10, %v540_v46, %v542_v25  ;;  %v545_v48 = vsel %vm543_vm10, %v542_v25, %v540_v46  ;;  %v610_v49 = vpop.permute.xlu0 %609  ;;  %v1184_v46 = vld [vmem:[%s1651_s4 + $0x60] sm:$0xff] }
 0x11f   : > { %v546_v50 = vmul.f32 %v1134_v27, %v545_v48  ;;  %v547_v51 = vmul.f32 %v1135_v29, %v544_v47  ;;  %v612_v52 = vsel %vm611_vm11, %v608_v35, %v610_v49  ;;  %v613_v53 = vsel %vm611_vm11, %v610_v49, %v608_v35  ;;  %v1021_v47 = vld [vmem:[%s1653_s6] sm:$0xff]  ;;  %v1022_v48 = vld [vmem:[%s1653_s6 + $0x8] sm:$0xff]  ;;  %v1178_v49 = vld [vmem:[%s1651_s4 + $0x50] sm:$0xff] }
 0x120   : > { %v616_v54 = vmul.f32 %v614_v43, %v613_v53  ;;  %v617_v55 = vmul.f32 %v615_v44, %v612_v52  ;;  %1025 = vperm.xlu1 %1255, %v1021_v47   ;;  %1030 = vperm.xlu2 %1254, %v1022_v48   ;;  %v1190_v52 = vld [vmem:[%s1651_s4 + $0x70] sm:$0xff]  ;;  %v1191_v53 = vld [vmem:[%s1651_s4 + $0x78] sm:$0xff] }
 0x121   : > { %572 = vmatpush.msra.mxu0 %v546_v50  ;;  %595 = vmatpush.msra.mxu1 %v547_v51  ;;  %v1185_v50 = vld [vmem:[%s1651_s4 + $0x68] sm:$0xff]  ;;  %v1179_v51 = vld [vmem:[%s1651_s4 + $0x58] sm:$0xff] }
 0x122   : > { %642 = vmatpush.msrb.mxu2 %v616_v54  ;;  %665 = vmatpush.msrb.mxu3 %v617_v55 }
 0x123   : > { %1151 = vmatmul.msk.f32.gmra.mxu0 %vm375_vm2, %v482_v56  ;;  %1153 = vmatmul.msk.f32.gmra.mxu1 %vm375_vm2, %v482_v56 }
 0x124   : > { %1162 = vmatmul.msk.f32.vlgmr.msrb.gmra.mxu2 %vm375_vm2, %v1160_v58  ;;  %1164 = vmatmul.msk.f32.vlgmr.msrb.gmra.mxu3 %vm375_vm2, %v1160_v58 }
 0x125   : > { %v678_v59 = vpop.permute.xlu1 %677  ;;  %v451_v54 = vpop.permute.xlu2 %450 }
 0x126   : > { %v682_v60 = vsel %vm681_vm12, %v678_v59, %v680_v57  ;;  %v683_v61 = vsel %vm681_vm12, %v680_v57, %v678_v59  ;;  %v746_v62 = vpop.permute.xlu0 %745 }
 0x127   : > { %v684_v63 = vmul.f32 %v1468_v28, %v683_v61  ;;  %v685_v0 = vmul.f32 %v1472_v30, %v682_v60  ;;  %v1166_v30 = vld [vmem:[%s1651_s4 + $0x30] sm:$0xff] }
 0x128   : > { %v1534_v21 = vpop.f32.mrf.mxu3 }
 0x129   : > { %710 = vmatpush.msrb.mxu0 %v684_v63  ;;  %733 = vmatpush.msrb.mxu1 %v685_v0  ;;  %v1536_v22 = vpop.f32.mrf.mxu2  ;;  %v459_v56 = vadd.f32 %v451_v54, %v1534_v21 }
 0x12a   : > { %v458_v55 = vadd.f32 %v451_v54, %v1536_v22 }
 0x12b   : > { %1156 = vmatmul.msk.f32.vlgmr.msra.gmra.mxu0 %vm375_vm2, %v1154_v1  ;;  %1158 = vmatmul.msk.f32.vlgmr.msra.gmra.mxu1 %vm375_vm2, %v1154_v1  ;;  %v463_v58 = vmax.f32 %v459_v56, 0.0 }
 0x12c   : > { %1163 = vmatmul.msk.f32.gmra.mxu2 %vm375_vm2, %v1161_v4  ;;  %1165 = vmatmul.msk.f32.gmra.mxu3 %vm375_vm2, %v1161_v4  ;;  %v462_v57 = vmax.f32 %v458_v55, 0.0 }
 0x12d   : > { %v748_v8 = vpop.permute.xlu1 %747  ;;  %467 = vst [vmem:[%s1565_s13 + $0x8] sm:$0xff] %v463_v58 }
 0x12e   : > { %v750_v9 = vsel %vm749_vm15, %v746_v62, %v748_v8  ;;  %v751_v10 = vsel %vm749_vm15, %v748_v8, %v746_v62  ;;  %v816_v11 = vpop.permute.xlu0 %815  ;;  %466 = vst [vmem:[%s1565_s13] sm:$0xff] %v462_v57 }
 0x12f   : > { %v752_v12 = vmul.f32 %v1481_v41, %v750_v9  ;;  %v753_v13 = vmul.f32 %v1484_v42, %v751_v10  ;;  %v818_v14 = vsel %vm817_vm0, %v814_v5, %v816_v11  ;;  %v819_v15 = vsel %vm817_vm0, %v816_v11, %v814_v5  ;;  %v1167_v41 = vld [vmem:[%s1651_s4 + $0x38] sm:$0xff] }
 0x130   : > { %v822_v16 = vmul.f32 %v820_v6, %v818_v14  ;;  %v823_v17 = vmul.f32 %v821_v7, %v819_v15  ;;  %v437_v34 = vpop.f32.mrf.mxu3 }
 0x131   : > { %778 = vmatpush.msra.mxu2 %v752_v12  ;;  %801 = vmatpush.msra.mxu3 %v753_v13  ;;  %v408_v35 = vpop.f32.mrf.mxu2 }
 0x132   : > { %848 = vmatpush.msra.mxu0 %v822_v16  ;;  %871 = vmatpush.msra.mxu1 %v823_v17 }
 0x133   : > { %1157 = vmatmul.msk.f32.gmra.mxu0 %vm375_vm2, %v1155_v18  ;;  %1159 = vmatmul.msk.f32.gmra.mxu1 %vm375_vm2, %v1155_v18 }
 0x134   : > { %1174 = vmatmul.msk.f32.vlgmr.msra.gmra.mxu2 %vm375_vm2, %v1172_v20  ;;  %1176 = vmatmul.msk.f32.vlgmr.msra.gmra.mxu3 %vm375_vm2, %v1172_v20 }
 0x135   : > { %v884_v24 = vpop.permute.xlu1 %883 }
 0x136   : > { %v888_v25 = vsel %vm887_vm1, %v884_v24, %v886_v23  ;;  %v889_v26 = vsel %vm887_vm1, %v886_v23, %v884_v24  ;;  %v952_v27 = vpop.permute.xlu0 %951 }
 0x137   : > { %v890_v28 = vmul.f32 %v1136_v2, %v888_v25  ;;  %v891_v29 = vmul.f32 %v1137_v3, %v889_v26 }
 0x138   : > { %v440_v60 = vpop.f32.mrf.mxu3 }
 0x139   : > { %916 = vmatpush.msrb.mxu2 %v890_v28  ;;  %939 = vmatpush.msrb.mxu3 %v891_v29  ;;  %v411_v59 = vpop.f32.mrf.mxu2 }
 0x13b   : > { %1168 = vmatmul.msk.f32.vlgmr.msrb.gmra.mxu0 %vm375_vm2, %v1166_v30  ;;  %1170 = vmatmul.msk.f32.vlgmr.msrb.gmra.mxu1 %vm375_vm2, %v1166_v30 }
 0x13c   : > { %1175 = vmatmul.msk.f32.gmra.mxu2 %vm375_vm2, %v1173_v31  ;;  %1177 = vmatmul.msk.f32.gmra.mxu3 %vm375_vm2, %v1173_v31 }
 0x13d   : > { %v954_v36 = vpop.permute.xlu1 %953 }
 0x13e   : > { %v956_v37 = vsel %vm955_vm3, %v952_v27, %v954_v36  ;;  %v957_v38 = vsel %vm955_vm3, %v954_v36, %v952_v27  ;;  %v456_v39 = vpop.permute.xlu0 %455 }
 0x13f   : > { %v960_v40 = vmul.f32 %v958_v32, %v956_v37  ;;  %v961_v43 = vmul.f32 %v959_v33, %v957_v38  ;;  %v461_v44 = vadd.f32 %v456_v39, %v437_v34  ;;  %v460_v19 = vadd.f32 %v456_v39, %v408_v35 }
 0x140   : > { %v443_v2 = vpop.f32.mrf.mxu3 }
 0x141   : > { %v465_v42 = vmax.f32 %v461_v44, 0.0  ;;  %v464_v45 = vmax.f32 %v460_v19, 0.0  ;;  %986 = vmatpush.msrb.mxu0 %v960_v40  ;;  %1009 = vmatpush.msrb.mxu1 %v961_v43  ;;  %v414_v1 = vpop.f32.mrf.mxu2 }
 0x143   : > { %469 = vst [vmem:[%s1565_s13 + $0x18] sm:$0xff] %v465_v42  ;;  %1169 = vmatmul.msk.f32.gmra.mxu0 %vm375_vm2, %v1167_v41  ;;  %1171 = vmatmul.msk.f32.gmra.mxu1 %vm375_vm2, %v1167_v41 }
 0x144   : > { %468 = vst [vmem:[%s1565_s13 + $0x10] sm:$0xff] %v464_v45  ;;  %1186 = vmatmul.msk.f32.vlgmr.msrb.gmra.mxu2 %vm375_vm2, %v1184_v46  ;;  %1188 = vmatmul.msk.f32.vlgmr.msrb.gmra.mxu3 %vm375_vm2, %v1184_v46 }
 0x14b   : > { %1180 = vmatmul.msk.f32.vlgmr.msra.gmra.mxu0 %vm375_vm2, %v1178_v49  ;;  %1182 = vmatmul.msk.f32.vlgmr.msra.gmra.mxu1 %vm375_vm2, %v1178_v49 }
 0x14c   : > { %1187 = vmatmul.msk.f32.gmra.mxu2 %vm375_vm2, %v1185_v50  ;;  %1189 = vmatmul.msk.f32.gmra.mxu3 %vm375_vm2, %v1185_v50 }
 0x153   : > { %1181 = vmatmul.msk.f32.gmra.mxu0 %vm375_vm2, %v1179_v51  ;;  %1183 = vmatmul.msk.f32.gmra.mxu1 %vm375_vm2, %v1179_v51 }
 0x15b   : > { %1192 = vmatmul.msk.f32.vlgmr.msrb.gmra.mxu0 %vm375_vm2, %v1190_v52  ;;  %1194 = vmatmul.msk.f32.vlgmr.msrb.gmra.mxu1 %vm375_vm2, %v1190_v52 }
 0x163   : > { %1193 = vmatmul.msk.f32.gmra.mxu0 %vm375_vm2, %v1191_v53  ;;  %1195 = vmatmul.msk.f32.gmra.mxu1 %vm375_vm2, %v1191_v53 }
 0x192   : > { %v1026_v47 = vpop.permute.xlu1 %1025 }
 0x198   : > { %v506_v61 = vpop.f32.mrf.mxu0  ;;  %v529_v62 = vpop.f32.mrf.mxu1 }
 0x199   : > { %v535_v17 = vadd.f32 %v506_v61, %v411_v59  ;;  %v536_v18 = vadd.f32 %v529_v62, %v440_v60 }
 0x1a0   : > { %v509_v63 = vpop.f32.mrf.mxu0  ;;  %v532_v0 = vpop.f32.mrf.mxu1 }
 0x1a1   : > { %v537_v28 = vadd.f32 %v509_v63, %v414_v1  ;;  %v538_v29 = vadd.f32 %v532_v0, %v443_v2 }
 0x1a7   : > { %v644_v5 = vpop.f32.mrf.mxu2  ;;  %v667_v6 = vpop.f32.mrf.mxu3 }
 0x1a8   : > { %v574_v3 = vpop.f32.mrf.mxu0  ;;  %v597_v4 = vpop.f32.mrf.mxu1 }
 0x1a9   : > { %v603_v20 = vadd.f32 %v574_v3, %v535_v17  ;;  %v604_v21 = vadd.f32 %v597_v4, %v536_v18  ;;  %v1031_v4 = vpop.permute.xlu2 %1030 }
 0x1ab   : > { %v673_v26 = vadd.f32 %v644_v5, %v603_v20  ;;  %v674_v27 = vadd.f32 %v667_v6, %v604_v21 }
 0x1af   : > { %v647_v9 = vpop.f32.mrf.mxu2  ;;  %v670_v10 = vpop.f32.mrf.mxu3 }
 0x1b0   : > { %v577_v7 = vpop.f32.mrf.mxu0  ;;  %v600_v8 = vpop.f32.mrf.mxu1 }
 0x1b1   : > { %v605_v32 = vadd.f32 %v577_v7, %v537_v28  ;;  %v606_v33 = vadd.f32 %v600_v8, %v538_v29 }
 0x1b3   : > { %v675_v40 = vadd.f32 %v647_v9, %v605_v32  ;;  %v676_v43 = vadd.f32 %v670_v10, %v606_v33 }
 0x1b7   : > { %v780_v13 = vpop.f32.mrf.mxu2  ;;  %v803_v14 = vpop.f32.mrf.mxu3 }
 0x1b8   : > { %v712_v11 = vpop.f32.mrf.mxu0  ;;  %v735_v12 = vpop.f32.mrf.mxu1 }
 0x1b9   : > { %v741_v30 = vadd.f32 %v712_v11, %v673_v26  ;;  %v742_v31 = vadd.f32 %v735_v12, %v674_v27 }
 0x1bb   : > { %v809_v36 = vadd.f32 %v780_v13, %v741_v30  ;;  %v810_v37 = vadd.f32 %v803_v14, %v742_v31 }
 0x1bf   : > { %v783_v22 = vpop.f32.mrf.mxu2  ;;  %v806_v23 = vpop.f32.mrf.mxu3 }
 0x1c0   : > { %v715_v15 = vpop.f32.mrf.mxu0  ;;  %v738_v16 = vpop.f32.mrf.mxu1 }
 0x1c1   : > { %v743_v41 = vadd.f32 %v715_v15, %v675_v40  ;;  %v744_v42 = vadd.f32 %v738_v16, %v676_v43 }
 0x1c3   : > { %v811_v50 = vadd.f32 %v783_v22, %v743_v41  ;;  %v812_v51 = vadd.f32 %v806_v23, %v744_v42 }
 0x1c7   : > { %v918_v38 = vpop.f32.mrf.mxu2  ;;  %v941_v39 = vpop.f32.mrf.mxu3 }
 0x1c8   : > { %v850_v24 = vpop.f32.mrf.mxu0  ;;  %v873_v25 = vpop.f32.mrf.mxu1 }
 0x1c9   : > { %v879_v44 = vadd.f32 %v850_v24, %v809_v36  ;;  %v880_v19 = vadd.f32 %v873_v25, %v810_v37 }
 0x1cb   : > { %v947_v45 = vadd.f32 %v918_v38, %v879_v44  ;;  %v948_v46 = vadd.f32 %v941_v39, %v880_v19 }
 0x1cf   : > { %v921_v58 = vpop.f32.mrf.mxu2  ;;  %v944_v59 = vpop.f32.mrf.mxu3 }
 0x1d0   : > { %v853_v34 = vpop.f32.mrf.mxu0  ;;  %v876_v35 = vpop.f32.mrf.mxu1 }
 0x1d1   : > { %v881_v54 = vadd.f32 %v853_v34, %v811_v50  ;;  %v882_v55 = vadd.f32 %v876_v35, %v812_v51 }
 0x1d3   : > { %v949_v62 = vadd.f32 %v921_v58, %v881_v54  ;;  %v950_v63 = vadd.f32 %v944_v59, %v882_v55 }
 0x1d8   : > { %v988_v48 = vpop.f32.mrf.mxu0  ;;  %v1011_v49 = vpop.f32.mrf.mxu1 }
 0x1d9   : > { %v1017_v52 = vadd.f32 %v988_v48, %v947_v45  ;;  %v1018_v53 = vadd.f32 %v1011_v49, %v948_v46 }
 0x1db   : > { %v1033_v56 = vadd.f32 %v1026_v47, %v1017_v52  ;;  %v1034_v57 = vadd.f32 %v1026_v47, %v1018_v53 }
 0x1dd   : > { %v1037_v60 = vmax.f32 %v1033_v56, 0.0  ;;  %v1038_v61 = vmax.f32 %v1034_v57, 0.0 }
 0x1df   : > { %1041 = vst [vmem:[%s1565_s13 + $0x20] sm:$0xff] %v1037_v60 }
 0x1e0   : > { %1042 = vst [vmem:[%s1565_s13 + $0x28] sm:$0xff] %v1038_v61  ;;  %v991_v0 = vpop.f32.mrf.mxu0  ;;  %v1014_v1 = vpop.f32.mrf.mxu1 }
 0x1e1   : > { %v1019_v2 = vadd.f32 %v991_v0, %v949_v62  ;;  %v1020_v3 = vadd.f32 %v1014_v1, %v950_v63 }
 0x1e3   : > { %v1035_v5 = vadd.f32 %v1031_v4, %v1019_v2  ;;  %v1036_v6 = vadd.f32 %v1031_v4, %v1020_v3 }
 0x1e5   : > { %v1039_v7 = vmax.f32 %v1035_v5, 0.0  ;;  %v1040_v8 = vmax.f32 %v1036_v6, 0.0 }
 0x1e7   : > { %1043 = vst [vmem:[%s1565_s13 + $0x30] sm:$0xff] %v1039_v7 }
 0x1e8   : > { %1044 = vst [vmem:[%s1565_s13 + $0x38] sm:$0xff] %v1040_v8 }
 0x1e9   : > { %1283 = shalt.err (!%p1280_p3)
}
 0x1ea   : > { %s1330_s20 = smov 256  }
 0x1eb   : > { %1203 = dma.vmem_to_hbm [thread:$0]  (%p1409_p5), %s1059_s22, 1024, %s1061_s28, %s1046_s23, %s1330_s20, %s1330_s20, %s1321_s29  }
 0x1ec PF: > { %p1209_p4 = scmp.ge.s32.totalorder %s1318_s27, 2  ;;  %s1075_s13 = sand.u32 1, %s1306_s24  }
 0x1ed   : > { %s1076_s19 = scalar_lea.sflag [#allocation3], %s1075_s13 }
 0x1ee   : > { %p1206_p7 = pnand %p1209_p4, %p1413_p6 }
 0x1f0   : > { %p1207_p8 = pneg %p1206_p7 }
 0x1f2   : > { %1301 = dma.done.wait (%p1207_p8), %s1076_s19, 1024  }
 0x1f3   : > { %1303 = vsyncadd (%p1207_p8), %s1076_s19, 4294966272  ;;  %p17_p9 = scmp.ge.s32.totalorder %s1396_s30, 4   ;;  %s1657_s24 = smov %s1310_s25 }
 0x1f4   : > { %s1658_s25 = smov %s1314_s26  ;;  %s1659_s26 = smov %s1407_s10 }
 0x1f5   : > { %s1660_s27 = smov %s1396_s30  ;;  %19 = sbr.rel (!%p17_p9) target bundleno = 3 (0x3), region = 90 }
 0x1fa   :  { %1082 = vsyncpa [#allocation3], 1 }
 0x1fb   :  { %1084 = vsyncpa [#allocation3 + $0x1], 1 }

</bundles_post_ra>
